<compile_context>
chip_gen: v7x
topology: tpu7x:2x2x1
jax: 0.10.0
libtpu: 0.0.40
codegen_flags: <defaults>
</compile_context>

<pallas_src>
import functools

import jax
import jax.numpy as jnp
from jax.experimental import pallas as pl
from jax.experimental.pallas import tpu as pltpu


def _make_rnn_wavefront_kernel(num_layers, seq_len, batch, input_size, hidden):
    """Build the Pallas kernel body (all sizes are static Python ints)."""
    L, S, B, I, H = num_layers, seq_len, batch, input_size, hidden

    def kernel(x_ref, w_ih0_ref, w_pack_ref, b_ref, fc_w_ref, fc_b_ref, out_ref):
        # x_ref     : (S, B, I)    time-major input
        # w_ih0_ref : (I, H)       layer-0 input weights (pre-transposed)
        # w_pack_ref: (L*H, L*H)   block row l = [... w_hh_l  w_ih_{l+1} ...]
        # b_ref     : (1, L*H)     per-layer combined bias b_ih + b_hh
        # fc_w_ref  : (H, O)       fc_b_ref: (1, O)
        # out_ref   : (B, O)
        x = x_ref[...]
        w_pack = w_pack_ref[...]
        b = b_ref[...]

        # Hoisted layer-0 input projection + bias: one big matmul, completely
        # off the serial recurrence path.  Time-major => pre0[t] is a
        # contiguous (B, H) view, no strided gather per step.
        pre0 = (
            jnp.dot(x.reshape(S * B, I), w_ih0_ref[...],
                    preferred_element_type=jnp.float32)
            + b[:, 0:H]
        ).reshape(S, B, H)

        # Wavefront over layers: at wave w, layer l processes timestep w - l.
        # slots[l] holds h_l after its most recently processed timestep
        # (zeros before the layer starts, so h0 == 0 is handled for free).
        slots = [jnp.zeros((B, H), jnp.float32) for _ in range(L)]
        for w in range(S + L - 1):
            if w == 0:
                # Only layer 0 is active and its recurrent state is zero:
                # skip the packed matmul entirely.
                slots[0] = jnp.tanh(pre0[0])
                continue
            h_packed = jnp.concatenate(slots, axis=-1)            # (B, L*H)
            # One MXU push computes, for every layer l simultaneously:
            #   z_l = h_{l-1} @ w_ih_l  +  h_l @ w_hh_l
            z = jnp.dot(h_packed, w_pack, preferred_element_type=jnp.float32)
            new_slots = list(slots)
            for l in range(L):
                t = w - l
                if 0 <= t < S:                     # layer l active this wave
                    z_l = z[:, l * H:(l + 1) * H]
                    if l == 0:
                        new_slots[0] = jnp.tanh(pre0[t] + z_l)
                    else:
                        new_slots[l] = jnp.tanh(z_l + b[:, l * H:(l + 1) * H])
            slots = new_slots

        # fc on the top layer's final hidden state (== out[:, -1, :] @ fc_w).
        out_ref[...] = (
            jnp.dot(slots[L - 1], fc_w_ref[...],
                    preferred_element_type=jnp.float32)
            + fc_b_ref[...]
        )

    return kernel


def rnn_v0_forward(x, params, *, hidden_units, num_layers, output_size):
    """x: (B, S, input_size) float32, batch-first (as in the PyTorch module)."""
    B, S, I = x.shape
    H, L, O = hidden_units, num_layers, output_size

    # Time-major layout for the hoisted layer-0 projection (layout plumbing,
    # not compute hoisting).
    x_tm = jnp.transpose(x, (1, 0, 2))                    # (S, B, I)

    # Pack per-layer weights into one block-bidiagonal matrix + one bias row
    # (fewer prologue DMAs; enables the single packed matmul per wave).
    w_ih0 = params["layers"][0][0]                        # (I, H)
    w_pack = jnp.zeros((L * H, L * H), jnp.float32)
    b_all = jnp.zeros((1, L * H), jnp.float32)
    for l, (_, w_hh, bias) in enumerate(params["layers"]):
        w_pack = w_pack.at[l * H:(l + 1) * H, l * H:(l + 1) * H].set(w_hh)
        b_all = b_all.at[:, l * H:(l + 1) * H].set(bias)
        if l + 1 < L:
            w_ih_next = params["layers"][l + 1][0]        # (H, H)
            w_pack = w_pack.at[l * H:(l + 1) * H,
                               (l + 1) * H:(l + 2) * H].set(w_ih_next)

    inputs = (x_tm, w_ih0, w_pack, b_all, params["fc_w"], params["fc_b"])

    kernel = _make_rnn_wavefront_kernel(L, S, B, I, H)

    # Advisory cost hint for XLA scheduling around the call.
    flops = (2 * S * B * I * H                              # hoisted layer-0 proj
             + 2 * (S + L - 2) * B * (L * H) * (L * H)      # wavefront matmuls
             + 2 * B * H * O)                               # fc
    transcendentals = L * S * B * H                         # tanh count
    bytes_accessed = (sum(int(a.size) * a.dtype.itemsize for a in inputs)
                      + B * O * 4)

    # NOTE: at these toy shapes everything fits in VMEM on every generation.
    # If B/S/H scale up: add a grid over batch with
    # dimension_semantics=("parallel",) to light up v7x's 2nd TensorCore,
    # switch the recurrence to lax.fori_loop(unroll=True) chunks, and
    # re-derive the VMEM budget against 64 MiB physical on v7x.
    out = pl.pallas_call(
        kernel,
        out_shape=jax.ShapeDtypeStruct((B, O), jnp.float32),
        in_specs=[pl.BlockSpec(memory_space=pltpu.MemorySpace.VMEM)
                  for _ in inputs],
        out_specs=pl.BlockSpec(memory_space=pltpu.MemorySpace.VMEM),
        compiler_params=pltpu.CompilerParams(
            vmem_limit_bytes=32 * 1024 * 1024),
        cost_estimate=pl.CostEstimate(flops=flops,
                                      transcendentals=transcendentals,
                                      bytes_accessed=bytes_accessed),
    )(*inputs)
    return out


def rnn_v0_reference(x, params):
    """Pure-JAX reference matching torch.nn.RNN(batch_first=True) + Linear."""
    B = x.shape[0]
    inp = x
    for (w_ih, w_hh, b) in params["layers"]:
        H = w_hh.shape[0]
        h = jnp.zeros((B, H), jnp.float32)
        outs = []
        for t in range(inp.shape[1]):
            h = jnp.tanh(inp[:, t, :] @ w_ih + h @ w_hh + b)
            outs.append(h)
        inp = jnp.stack(outs, axis=1)
    return inp[:, -1, :] @ params["fc_w"] + params["fc_b"]


def init_params(key, input_size, hidden_units, num_layers, output_size):
    """Deterministic init mirroring PyTorch shapes (weights stored transposed:
    (in_features, out_features)); b is the combined b_ih + b_hh."""
    bound = 1.0 / jnp.sqrt(hidden_units)
    layers = []
    for l in range(num_layers):
        in_dim = input_size if l == 0 else hidden_units
        key, k1, k2, k3 = jax.random.split(key, 4)
        w_ih = jax.random.uniform(k1, (in_dim, hidden_units), jnp.float32,
                                  -bound, bound)
        w_hh = jax.random.uniform(k2, (hidden_units, hidden_units), jnp.float32,
                                  -bound, bound)
        b = jax.random.uniform(k3, (1, hidden_units), jnp.float32,
                               -bound, bound)
        layers.append((w_ih, w_hh, b))
    key, k1, k2 = jax.random.split(key, 3)
    fc_bound = 1.0 / jnp.sqrt(hidden_units)
    fc_w = jax.random.uniform(k1, (hidden_units, output_size), jnp.float32,
                              -fc_bound, fc_bound)
    fc_b = jax.random.uniform(k2, (1, output_size), jnp.float32,
                              -fc_bound, fc_bound)
    return {"layers": layers, "fc_w": fc_w, "fc_b": fc_b}


if __name__ == "__main__":
    # Small shapes consistent with the module's forward.
    BATCH, SEQ, INPUT_SIZE = 8, 8, 16
    HIDDEN_UNITS, NUM_LAYERS, OUTPUT_SIZE = 32, 2, 4

    key = jax.random.PRNGKey(0)
    key, kx = jax.random.split(key)
    x = jax.random.normal(kx, (BATCH, SEQ, INPUT_SIZE), jnp.float32)

    params = init_params(key, INPUT_SIZE, HIDDEN_UNITS, NUM_LAYERS, OUTPUT_SIZE)

    fwd = jax.jit(functools.partial(
        rnn_v0_forward,
        hidden_units=HIDDEN_UNITS,
        num_layers=NUM_LAYERS,
        output_size=OUTPUT_SIZE,
    ))
    out = fwd(x, params)
    jax.block_until_ready(out)

    ref = rnn_v0_reference(x, params)
    assert out.shape == (BATCH, OUTPUT_SIZE)
    assert jnp.allclose(out, ref, atol=1e-5, rtol=1e-5), (
        f"max abs err {jnp.max(jnp.abs(out - ref))}")

    print("KERNEL_OK")
</pallas_src>

<mosaic_0001>
module attributes {stable_mosaic.version = 11 : i64} {
  func.func @kernel(%arg0: memref<8x8x16xf32, #tpu.memory_space<vmem>>, %arg1: memref<16x32xf32, #tpu.memory_space<vmem>>, %arg2: memref<64x64xf32, #tpu.memory_space<vmem>>, %arg3: memref<1x64xf32, #tpu.memory_space<vmem>>, %arg4: memref<32x4xf32, #tpu.memory_space<vmem>>, %arg5: memref<1x4xf32, #tpu.memory_space<vmem>>, %arg6: memref<8x4xf32, #tpu.memory_space<vmem>>) attributes {dimension_semantics = [], scalar_prefetch = 0 : i64, scratch_operands = 0 : i64, tpu.core_type = #tpu.core_type<tc>} {
    %c0 = arith.constant 0 : index
    %c0_0 = arith.constant 0 : index
    %c0_1 = arith.constant 0 : index
    %0 = vector.load %arg0[%c0, %c0_0, %c0_1] : memref<8x8x16xf32, #tpu.memory_space<vmem>>, vector<8x8x16xf32>
    %c0_2 = arith.constant 0 : index
    %c0_3 = arith.constant 0 : index
    %1 = vector.load %arg2[%c0_2, %c0_3] : memref<64x64xf32, #tpu.memory_space<vmem>>, vector<64x64xf32>
    %c0_4 = arith.constant 0 : index
    %c0_5 = arith.constant 0 : index
    %2 = vector.load %arg3[%c0_4, %c0_5] : memref<1x64xf32, #tpu.memory_space<vmem>>, vector<1x64xf32>
    %3 = vector.shape_cast %0 : vector<8x8x16xf32> to vector<64x16xf32>
    %c0_6 = arith.constant 0 : index
    %c0_7 = arith.constant 0 : index
    %4 = vector.load %arg1[%c0_6, %c0_7] : memref<16x32xf32, #tpu.memory_space<vmem>>, vector<16x32xf32>
    %cst = arith.constant dense<0.000000e+00> : vector<64x32xf32>
    %5 = tpu.matmul %3, %4, %cst {dimension_numbers = #tpu.dot_dimension_numbers<[1], [0], [0], [1], [0, 0, 1, 1], [], []>} : vector<64x16xf32>, vector<16x32xf32>, vector<64x32xf32> -> vector<64x32xf32>
    %6 = vector.extract_strided_slice %2 {offsets = [0, 0], sizes = [1, 32], strides = [1, 1]} : vector<1x64xf32> to vector<1x32xf32>
    %7 = vector.broadcast %6 : vector<1x32xf32> to vector<64x32xf32>
    %8 = arith.addf %5, %7 : vector<64x32xf32>
    %9 = vector.shape_cast %8 : vector<64x32xf32> to vector<8x8x32xf32>
    %cst_8 = arith.constant 0.000000e+00 : f32
    %10 = vector.broadcast %cst_8 : f32 to vector<8x32xf32>
    %11 = vector.extract_strided_slice %9 {offsets = [0, 0, 0], sizes = [1, 8, 32], strides = [1, 1, 1]} : vector<8x8x32xf32> to vector<1x8x32xf32>
    %12 = vector.shape_cast %11 : vector<1x8x32xf32> to vector<8x32xf32>
    %13 = math.tanh %12 : vector<8x32xf32>
    %14 = tpu.concatenate %13, %10 in 1 : vector<8x32xf32>, vector<8x32xf32> -> vector<8x64xf32>
    %cst_9 = arith.constant dense<0.000000e+00> : vector<8x64xf32>
    %15 = tpu.matmul %14, %1, %cst_9 {dimension_numbers = #tpu.dot_dimension_numbers<[1], [0], [0], [1], [0, 0, 1, 1], [], []>} : vector<8x64xf32>, vector<64x64xf32>, vector<8x64xf32> -> vector<8x64xf32>
    %16 = vector.extract_strided_slice %15 {offsets = [0, 0], sizes = [8, 32], strides = [1, 1]} : vector<8x64xf32> to vector<8x32xf32>
    %17 = vector.extract_strided_slice %9 {offsets = [1, 0, 0], sizes = [1, 8, 32], strides = [1, 1, 1]} : vector<8x8x32xf32> to vector<1x8x32xf32>
    %18 = vector.shape_cast %17 : vector<1x8x32xf32> to vector<8x32xf32>
    %19 = arith.addf %18, %16 : vector<8x32xf32>
    %20 = math.tanh %19 : vector<8x32xf32>
    %21 = vector.extract_strided_slice %15 {offsets = [0, 32], sizes = [8, 32], strides = [1, 1]} : vector<8x64xf32> to vector<8x32xf32>
    %22 = vector.extract_strided_slice %2 {offsets = [0, 32], sizes = [1, 32], strides = [1, 1]} : vector<1x64xf32> to vector<1x32xf32>
    %23 = vector.broadcast %22 : vector<1x32xf32> to vector<8x32xf32>
    %24 = arith.addf %21, %23 : vector<8x32xf32>
    %25 = math.tanh %24 : vector<8x32xf32>
    %26 = tpu.concatenate %20, %25 in 1 : vector<8x32xf32>, vector<8x32xf32> -> vector<8x64xf32>
    %cst_10 = arith.constant dense<0.000000e+00> : vector<8x64xf32>
    %27 = tpu.matmul %26, %1, %cst_10 {dimension_numbers = #tpu.dot_dimension_numbers<[1], [0], [0], [1], [0, 0, 1, 1], [], []>} : vector<8x64xf32>, vector<64x64xf32>, vector<8x64xf32> -> vector<8x64xf32>
    %28 = vector.extract_strided_slice %27 {offsets = [0, 0], sizes = [8, 32], strides = [1, 1]} : vector<8x64xf32> to vector<8x32xf32>
    %29 = vector.extract_strided_slice %9 {offsets = [2, 0, 0], sizes = [1, 8, 32], strides = [1, 1, 1]} : vector<8x8x32xf32> to vector<1x8x32xf32>
    %30 = vector.shape_cast %29 : vector<1x8x32xf32> to vector<8x32xf32>
    %31 = arith.addf %30, %28 : vector<8x32xf32>
    %32 = math.tanh %31 : vector<8x32xf32>
    %33 = vector.extract_strided_slice %27 {offsets = [0, 32], sizes = [8, 32], strides = [1, 1]} : vector<8x64xf32> to vector<8x32xf32>
    %34 = vector.extract_strided_slice %2 {offsets = [0, 32], sizes = [1, 32], strides = [1, 1]} : vector<1x64xf32> to vector<1x32xf32>
    %35 = vector.broadcast %34 : vector<1x32xf32> to vector<8x32xf32>
    %36 = arith.addf %33, %35 : vector<8x32xf32>
    %37 = math.tanh %36 : vector<8x32xf32>
    %38 = tpu.concatenate %32, %37 in 1 : vector<8x32xf32>, vector<8x32xf32> -> vector<8x64xf32>
    %cst_11 = arith.constant dense<0.000000e+00> : vector<8x64xf32>
    %39 = tpu.matmul %38, %1, %cst_11 {dimension_numbers = #tpu.dot_dimension_numbers<[1], [0], [0], [1], [0, 0, 1, 1], [], []>} : vector<8x64xf32>, vector<64x64xf32>, vector<8x64xf32> -> vector<8x64xf32>
    %40 = vector.extract_strided_slice %39 {offsets = [0, 0], sizes = [8, 32], strides = [1, 1]} : vector<8x64xf32> to vector<8x32xf32>
    %41 = vector.extract_strided_slice %9 {offsets = [3, 0, 0], sizes = [1, 8, 32], strides = [1, 1, 1]} : vector<8x8x32xf32> to vector<1x8x32xf32>
    %42 = vector.shape_cast %41 : vector<1x8x32xf32> to vector<8x32xf32>
    %43 = arith.addf %42, %40 : vector<8x32xf32>
    %44 = math.tanh %43 : vector<8x32xf32>
    %45 = vector.extract_strided_slice %39 {offsets = [0, 32], sizes = [8, 32], strides = [1, 1]} : vector<8x64xf32> to vector<8x32xf32>
    %46 = vector.extract_strided_slice %2 {offsets = [0, 32], sizes = [1, 32], strides = [1, 1]} : vector<1x64xf32> to vector<1x32xf32>
    %47 = vector.broadcast %46 : vector<1x32xf32> to vector<8x32xf32>
    %48 = arith.addf %45, %47 : vector<8x32xf32>
    %49 = math.tanh %48 : vector<8x32xf32>
    %50 = tpu.concatenate %44, %49 in 1 : vector<8x32xf32>, vector<8x32xf32> -> vector<8x64xf32>
    %cst_12 = arith.constant dense<0.000000e+00> : vector<8x64xf32>
    %51 = tpu.matmul %50, %1, %cst_12 {dimension_numbers = #tpu.dot_dimension_numbers<[1], [0], [0], [1], [0, 0, 1, 1], [], []>} : vector<8x64xf32>, vector<64x64xf32>, vector<8x64xf32> -> vector<8x64xf32>
    %52 = vector.extract_strided_slice %51 {offsets = [0, 0], sizes = [8, 32], strides = [1, 1]} : vector<8x64xf32> to vector<8x32xf32>
    %53 = vector.extract_strided_slice %9 {offsets = [4, 0, 0], sizes = [1, 8, 32], strides = [1, 1, 1]} : vector<8x8x32xf32> to vector<1x8x32xf32>
    %54 = vector.shape_cast %53 : vector<1x8x32xf32> to vector<8x32xf32>
    %55 = arith.addf %54, %52 : vector<8x32xf32>
    %56 = math.tanh %55 : vector<8x32xf32>
    %57 = vector.extract_strided_slice %51 {offsets = [0, 32], sizes = [8, 32], strides = [1, 1]} : vector<8x64xf32> to vector<8x32xf32>
    %58 = vector.extract_strided_slice %2 {offsets = [0, 32], sizes = [1, 32], strides = [1, 1]} : vector<1x64xf32> to vector<1x32xf32>
    %59 = vector.broadcast %58 : vector<1x32xf32> to vector<8x32xf32>
    %60 = arith.addf %57, %59 : vector<8x32xf32>
    %61 = math.tanh %60 : vector<8x32xf32>
    %62 = tpu.concatenate %56, %61 in 1 : vector<8x32xf32>, vector<8x32xf32> -> vector<8x64xf32>
    %cst_13 = arith.constant dense<0.000000e+00> : vector<8x64xf32>
    %63 = tpu.matmul %62, %1, %cst_13 {dimension_numbers = #tpu.dot_dimension_numbers<[1], [0], [0], [1], [0, 0, 1, 1], [], []>} : vector<8x64xf32>, vector<64x64xf32>, vector<8x64xf32> -> vector<8x64xf32>
    %64 = vector.extract_strided_slice %63 {offsets = [0, 0], sizes = [8, 32], strides = [1, 1]} : vector<8x64xf32> to vector<8x32xf32>
    %65 = vector.extract_strided_slice %9 {offsets = [5, 0, 0], sizes = [1, 8, 32], strides = [1, 1, 1]} : vector<8x8x32xf32> to vector<1x8x32xf32>
    %66 = vector.shape_cast %65 : vector<1x8x32xf32> to vector<8x32xf32>
    %67 = arith.addf %66, %64 : vector<8x32xf32>
    %68 = math.tanh %67 : vector<8x32xf32>
    %69 = vector.extract_strided_slice %63 {offsets = [0, 32], sizes = [8, 32], strides = [1, 1]} : vector<8x64xf32> to vector<8x32xf32>
    %70 = vector.extract_strided_slice %2 {offsets = [0, 32], sizes = [1, 32], strides = [1, 1]} : vector<1x64xf32> to vector<1x32xf32>
    %71 = vector.broadcast %70 : vector<1x32xf32> to vector<8x32xf32>
    %72 = arith.addf %69, %71 : vector<8x32xf32>
    %73 = math.tanh %72 : vector<8x32xf32>
    %74 = tpu.concatenate %68, %73 in 1 : vector<8x32xf32>, vector<8x32xf32> -> vector<8x64xf32>
    %cst_14 = arith.constant dense<0.000000e+00> : vector<8x64xf32>
    %75 = tpu.matmul %74, %1, %cst_14 {dimension_numbers = #tpu.dot_dimension_numbers<[1], [0], [0], [1], [0, 0, 1, 1], [], []>} : vector<8x64xf32>, vector<64x64xf32>, vector<8x64xf32> -> vector<8x64xf32>
    %76 = vector.extract_strided_slice %75 {offsets = [0, 0], sizes = [8, 32], strides = [1, 1]} : vector<8x64xf32> to vector<8x32xf32>
    %77 = vector.extract_strided_slice %9 {offsets = [6, 0, 0], sizes = [1, 8, 32], strides = [1, 1, 1]} : vector<8x8x32xf32> to vector<1x8x32xf32>
    %78 = vector.shape_cast %77 : vector<1x8x32xf32> to vector<8x32xf32>
    %79 = arith.addf %78, %76 : vector<8x32xf32>
    %80 = math.tanh %79 : vector<8x32xf32>
    %81 = vector.extract_strided_slice %75 {offsets = [0, 32], sizes = [8, 32], strides = [1, 1]} : vector<8x64xf32> to vector<8x32xf32>
    %82 = vector.extract_strided_slice %2 {offsets = [0, 32], sizes = [1, 32], strides = [1, 1]} : vector<1x64xf32> to vector<1x32xf32>
    %83 = vector.broadcast %82 : vector<1x32xf32> to vector<8x32xf32>
    %84 = arith.addf %81, %83 : vector<8x32xf32>
    %85 = math.tanh %84 : vector<8x32xf32>
    %86 = tpu.concatenate %80, %85 in 1 : vector<8x32xf32>, vector<8x32xf32> -> vector<8x64xf32>
    %cst_15 = arith.constant dense<0.000000e+00> : vector<8x64xf32>
    %87 = tpu.matmul %86, %1, %cst_15 {dimension_numbers = #tpu.dot_dimension_numbers<[1], [0], [0], [1], [0, 0, 1, 1], [], []>} : vector<8x64xf32>, vector<64x64xf32>, vector<8x64xf32> -> vector<8x64xf32>
    %88 = vector.extract_strided_slice %87 {offsets = [0, 0], sizes = [8, 32], strides = [1, 1]} : vector<8x64xf32> to vector<8x32xf32>
    %89 = vector.extract_strided_slice %9 {offsets = [7, 0, 0], sizes = [1, 8, 32], strides = [1, 1, 1]} : vector<8x8x32xf32> to vector<1x8x32xf32>
    %90 = vector.shape_cast %89 : vector<1x8x32xf32> to vector<8x32xf32>
    %91 = arith.addf %90, %88 : vector<8x32xf32>
    %92 = math.tanh %91 : vector<8x32xf32>
    %93 = vector.extract_strided_slice %87 {offsets = [0, 32], sizes = [8, 32], strides = [1, 1]} : vector<8x64xf32> to vector<8x32xf32>
    %94 = vector.extract_strided_slice %2 {offsets = [0, 32], sizes = [1, 32], strides = [1, 1]} : vector<1x64xf32> to vector<1x32xf32>
    %95 = vector.broadcast %94 : vector<1x32xf32> to vector<8x32xf32>
    %96 = arith.addf %93, %95 : vector<8x32xf32>
    %97 = math.tanh %96 : vector<8x32xf32>
    %98 = tpu.concatenate %92, %97 in 1 : vector<8x32xf32>, vector<8x32xf32> -> vector<8x64xf32>
    %cst_16 = arith.constant dense<0.000000e+00> : vector<8x64xf32>
    %99 = tpu.matmul %98, %1, %cst_16 {dimension_numbers = #tpu.dot_dimension_numbers<[1], [0], [0], [1], [0, 0, 1, 1], [], []>} : vector<8x64xf32>, vector<64x64xf32>, vector<8x64xf32> -> vector<8x64xf32>
    %100 = vector.extract_strided_slice %99 {offsets = [0, 32], sizes = [8, 32], strides = [1, 1]} : vector<8x64xf32> to vector<8x32xf32>
    %101 = vector.extract_strided_slice %2 {offsets = [0, 32], sizes = [1, 32], strides = [1, 1]} : vector<1x64xf32> to vector<1x32xf32>
    %102 = vector.broadcast %101 : vector<1x32xf32> to vector<8x32xf32>
    %103 = arith.addf %100, %102 : vector<8x32xf32>
    %104 = math.tanh %103 : vector<8x32xf32>
    %c0_17 = arith.constant 0 : index
    %c0_18 = arith.constant 0 : index
    %105 = vector.load %arg4[%c0_17, %c0_18] : memref<32x4xf32, #tpu.memory_space<vmem>>, vector<32x4xf32>
    %cst_19 = arith.constant dense<0.000000e+00> : vector<8x4xf32>
    %106 = tpu.matmul %104, %105, %cst_19 {dimension_numbers = #tpu.dot_dimension_numbers<[1], [0], [0], [1], [0, 0, 1, 1], [], []>} : vector<8x32xf32>, vector<32x4xf32>, vector<8x4xf32> -> vector<8x4xf32>
    %c0_20 = arith.constant 0 : index
    %c0_21 = arith.constant 0 : index
    %107 = vector.load %arg5[%c0_20, %c0_21] : memref<1x4xf32, #tpu.memory_space<vmem>>, vector<1x4xf32>
    %108 = vector.broadcast %107 : vector<1x4xf32> to vector<8x4xf32>
    %109 = arith.addf %106, %108 : vector<8x4xf32>
    %c0_22 = arith.constant 0 : index
    %c0_23 = arith.constant 0 : index
    %110 = vector.load %arg6[%c0_22, %c0_23] : memref<8x4xf32, #tpu.memory_space<vmem>>, vector<8x4xf32>
    tpu.vector_store %arg6[%c0_22, %c0_23], %109 {strides = array<i32>} : memref<8x4xf32, #tpu.memory_space<vmem>>, vector<8x4xf32>,
    return
  }
}

</mosaic_0001>

<bundles_post_ra>
// kernel: rnn_v0_forward.1
= control target key start
LH: loop header
LB: loop body
LE: loop exit
PB: predicated region body
PF: predicated region fallthrough
CT: control target
= control target key end

     0   :  { %vm48_vm0 = vcmask 130048   ;;  %v1322_v8 = vmov 0.0|0.0   ;;  %vm1323_vm1 = vmmov 0   ;;  %v1324_v15 = vmov 0.0   ;;  %s1325_s14 = smov 96   ;;  %s1580_s1 = inlined_call_operand.vmem [shape: f32[16,32], index: 1, kind: input, shape index: {}]   ;;  %s1581_s0 = inlined_call_operand.vmem [shape: f32[8,8,16], index: 0, kind: input, shape index: {}]   ;;  %s1582_s2 = inlined_call_operand.vmem [shape: f32[64,64], index: 2, kind: input, shape index: {}]   ;;  %s1583_s3 = inlined_call_operand.vmem [shape: f32[1,64], index: 3, kind: input, shape index: {}]   ;;  %s1584_s4 = inlined_call_operand.vmem [shape: f32[32,4], index: 4, kind: input, shape index: {}]   ;;  %s1585_s5 = inlined_call_operand.vmem [shape: f32[1,4], index: 5, kind: input, shape index: {}]   ;;  %s1586_s6 = inlined_call_operand.vmem [shape: f32[8,4], index: 6, kind: output, shape index: {}]  }
   0x1   :  { %v40_v0 = vld [vmem:[%s1580_s1] sm:$0xff]  ;;  %v41_v1 = vld [vmem:[%s1580_s1 + $0x8] sm:$0xff]  ;;  %1184 = vmatprep.subr.bf16.mxu1 %v1322_v8  ;;  %v33_v9 = vld [vmem:[%s1582_s2 + $0x10] sm:$0xff]  ;;  %1033 = vmatprep.mubr.msk.f32.mxu1 %vm1323_vm1, %v1324_v15  ;;  %vm179_vm2 = vcmask 261120   ;;  %vm181_vm3 = vcmask 523264   ;;  %vm889_vm4 = vcmask 31744  }
   0x2   :  { %v23_v2 = vld [vmem:[%s1581_s0] sm:$0xff]  ;;  %v1180_v3 = vpack.c.bf16 %v41_v1, %v40_v0  ;;  %v24_v4 = vld [vmem:[%s1581_s0 + $0x8] sm:$0xff]  ;;  %v34_v10 = vld [vmem:[%s1582_s2 + $0x18] sm:$0xff] }
   0x3   :  { %1005 = vmatprep.mubr.msk.f32.mxu0 %vm48_vm0, %v23_v2  ;;  %v31_v5 = vld [vmem:[%s1582_s2] sm:$0xff]  ;;  %v32_v6 = vld [vmem:[%s1582_s2 + $0x8] sm:$0xff]  ;;  %v1395_v11 = vpack.c.bf16 %v34_v10, %v33_v9  ;;  %v37_v16 = vld [vmem:[%s1582_s2 + $0x30] sm:$0xff] }
   0x4   :  { %1181 = vmatprep.subr.bf16.mxu0 %v1180_v3  ;;  %v1381_v7 = vpack.c.bf16 %v32_v6, %v31_v5  ;;  %v35_v12 = vld [vmem:[%s1582_s2 + $0x20] sm:$0xff]  ;;  %v36_v13 = vld [vmem:[%s1582_s2 + $0x28] sm:$0xff]  ;;  %v38_v17 = vld [vmem:[%s1582_s2 + $0x38] sm:$0xff] }
   0x5   :  { %1183 = vmatpush3.bf16.msra.mxu0 %v1180_v3  ;;  %v1404_v14 = vpack.c.bf16 %v36_v13, %v35_v12  ;;  %v1418_v18 = vpack.c.bf16 %v38_v17, %v37_v16  ;;  %v1430_v19 = vld [vmem:[%s1583_s3] ss:$0 sm:$0xff]  ;;  %v25_v25 = vld [vmem:[%s1581_s0 + $0x10] sm:$0xff]  ;;  %v26_v26 = vld [vmem:[%s1581_s0 + $0x18] sm:$0xff] }
   0x6   :  { %1196 = vmatprep.subr.bf16.mxu0 %v1322_v8  ;;  %1186 = vmatpush3.bf16.msra.mxu1 %v1381_v7  ;;  %v27_v27 = vld [vmem:[%s1581_s0 + $0x20] sm:$0xff]  ;;  %v28_v28 = vld [vmem:[%s1581_s0 + $0x28] sm:$0xff]  ;;  %v29_v29 = vld [vmem:[%s1581_s0 + $0x30] sm:$0xff] }
   0x7   :  { %1187 = vmatprep.subr.bf16.mxu1 %v1322_v8  ;;  %v30_v30 = vld [vmem:[%s1581_s0 + $0x38] sm:$0xff] }
   0x8   :  { %1006 = vmatmul.mubr.msk.f32.vlgmr.msra.gmra.mrb[0].mxu0 %vm48_vm0, %v24_v4 }
   0x9   :  { %1198 = vmatpush3.bf16.msra.mxu0 %v1381_v7  ;;  %1008 = vmatprep.mubr.msk.f32.mxu0 %vm48_vm0, %v25_v25 }
   0xa   :  { %1199 = vmatprep.subr.bf16.mxu0 %v1322_v8  ;;  %1189 = vmatpush3.bf16.msra.mxu1 %v1395_v11 }
   0xb   :  { %1190 = vmatprep.subr.bf16.mxu1 %v1322_v8 }
   0xc   :  { %1009 = vmatmul.mubr.msk.f32.gmra.mrb[2].mxu0 %vm48_vm0, %v26_v26 }
   0xd   :  { %1201 = vmatpush3.bf16.msra.mxu0 %v1395_v11  ;;  %1011 = vmatprep.mubr.msk.f32.mxu0 %vm48_vm0, %v27_v27 }
   0xe   :  { %1202 = vmatprep.subr.bf16.mxu0 %v1322_v8  ;;  %1192 = vmatpush3.bf16.msra.mxu1 %v1404_v14 }
   0xf   :  { %1193 = vmatprep.subr.bf16.mxu1 %v1322_v8 }
  0x10   :  { %1012 = vmatmul.mubr.msk.f32.gmra.mrb[4].mxu0 %vm48_vm0, %v28_v28 }
  0x11   :  { %1204 = vmatpush3.bf16.msra.mxu0 %v1404_v14  ;;  %1014 = vmatprep.mubr.msk.f32.mxu0 %vm48_vm0, %v29_v29 }
  0x12   :  { %1205 = vmatprep.subr.bf16.mxu0 %v1322_v8  ;;  %1195 = vmatpush3.bf16.msra.mxu1 %v1418_v18 }
  0x13   :  { %1208 = vmatprep.subr.bf16.mxu1 %v1322_v8 }
  0x14   :  { %1015 = vmatmul.mubr.msk.f32.gmra.mrb[6].mxu0 %vm48_vm0, %v30_v30 }
  0x15   :  { %1207 = vmatpush3.bf16.msra.mxu0 %v1418_v18  ;;  %1052 = vmatprep.mubr.msk.f32.mxu0 %vm1323_vm1, %v1324_v15 }
  0x16   :  { %1220 = vmatprep.subr.bf16.mxu0 %v1322_v8 }
  0xdb   :  { %v1007_v20 = vpop.f32.mrb[0].mxu0 }
  0xdc   :  { %v139_v21 = vpop.f32.mrb[1].mxu0  ;;  %v145_v31 = vadd.f32 %v1007_v20, %v1430_v19 }
  0xdd   :  { %v140_v22 = vadd.f32 %v1430_v19, %v139_v21 }
  0xdf   :  { %1290 = vtanh.f32 %v140_v22  ;;  %v1010_v39 = vpop.f32.mrb[2].mxu0 }
  0xe0   :  { %v149_v40 = vpop.f32.mrb[3].mxu0  ;;  %v155_v53 = vadd.f32 %v1010_v39, %v1430_v19 }
  0xe1   :  { %v150_v45 = vadd.f32 %v1430_v19, %v149_v40 }
  0xe3   :  { %v1485_v41 = vpop.f32.mrb[4].mxu0 }
  0xe4   :  { %v159_v42 = vpop.f32.mrb[5].mxu0  ;;  %v165_v5 = vadd.f32 %v1485_v41, %v1430_v19 }
  0xe5   :  { %v160_v61 = vadd.f32 %v1430_v19, %v159_v42  ;;  %v912_v42 = vld [vmem:[%s1585_s5] ss:$0 sm:$0xff] }
  0xe7   :  { %v1487_v43 = vpop.f32.mrb[6].mxu0 }
  0xe8   :  { %v1489_v44 = vpop.f32.mrb[7].mxu0 }
  0xe9   :  { %v1291_v23 = vpop.eup %1290  ;;  %v170_v20 = vadd.f32 %v1430_v19, %v1489_v44 }
  0xea   :  { %v180_v24 = vsel %vm179_vm2, %v1291_v23, 0.0 }
  0xeb   :  { %1034 = vmatmul.mubr.msk.f32.vlgmr.msra.gmra.mrb[0].mxu1 %vm181_vm3, %v180_v24 }
  0xec   :  { %1210 = vmatpush3.bf16.msra.mxu1 %v1381_v7  ;;  %1071 = vmatprep.mubr.msk.f32.mxu1 %vm1323_vm1, %v1324_v15 }
  0xed   :  { %1211 = vmatprep.subr.bf16.mxu1 %v1322_v8 }
  0xf0   :  { %1213 = vmatpush3.bf16.msra.mxu1 %v1395_v11 }
  0xf1   :  { %1214 = vmatprep.subr.bf16.mxu1 %v1322_v8 }
  0xf4   :  { %1216 = vmatpush3.bf16.msra.mxu1 %v1404_v14 }
  0xf5   :  { %1217 = vmatprep.subr.bf16.mxu1 %v1322_v8 }
  0xf8   :  { %1219 = vmatpush3.bf16.msra.mxu1 %v1418_v18 }
  0xf9   :  { %1232 = vmatprep.subr.bf16.mxu1 %v1322_v8 }
 0x1be   :  { %v251_v32 = vpop.f32.mrb[0].mxu1 }
 0x1bf   :  { %v255_v33 = vadd.f32 %v251_v32, %v145_v31  ;;  %v257_v34 = vadd.f32 %v1430_v19, %v251_v32  ;;  %v1035_v35 = vpop.f32.mrb[1].mxu1  ;;  %v804_v32 = vld [vmem:[%s1584_s4 + $0x8] sm:$0xff] }
 0x1c0   :  { %v806_v35 = vld [vmem:[%s1584_s4 + $0x18] sm:$0xff] }
 0x1c1   :  { %1292 = vtanh.f32 %v255_v33  ;;  %v805_v33 = vld [vmem:[%s1584_s4 + $0x10] sm:$0xff] }
 0x1c2   :  { %1294 = vtanh.f32 %v257_v34 }
 0x1cb   :  { %v1293_v36 = vpop.eup %1292 }
 0x1cc   :  { %v1295_v37 = vpop.eup %1294 }
 0x1cd   :  { %v259_v38 = vsel %vm179_vm2, %v1293_v36, %v1295_v37  ;;  %v1284_v36 = vpack.c.bf16 %v806_v35, %v805_v33 }
 0x1ce   :  { %1053 = vmatmul.mubr.msk.f32.vlgmr.msra.gmra.mrb[8].mxu0 %vm181_vm3, %v259_v38 }
 0x1cf   :  { %1222 = vmatpush3.bf16.msra.mxu0 %v1381_v7  ;;  %1090 = vmatprep.mubr.msk.f32.mxu0 %vm1323_vm1, %v1324_v15 }
 0x1d0   :  { %1223 = vmatprep.subr.bf16.mxu0 %v1322_v8 }
 0x1d3   :  { %1225 = vmatpush3.bf16.msra.mxu0 %v1395_v11 }
 0x1d4   :  { %1226 = vmatprep.subr.bf16.mxu0 %v1322_v8 }
 0x1d7   :  { %1228 = vmatpush3.bf16.msra.mxu0 %v1404_v14 }
 0x1d8   :  { %1229 = vmatprep.subr.bf16.mxu0 %v1322_v8 }
 0x1db   :  { %1231 = vmatpush3.bf16.msra.mxu0 %v1418_v18 }
 0x1dc   :  { %1244 = vmatprep.subr.bf16.mxu0 %v1322_v8 }
 0x2a1   :  { %v329_v46 = vpop.f32.mrb[8].mxu0 }
 0x2a2   :  { %v333_v47 = vadd.f32 %v329_v46, %v150_v45  ;;  %v335_v48 = vadd.f32 %v1430_v19, %v329_v46  ;;  %v1054_v49 = vpop.f32.mrb[9].mxu0 }
 0x2a4   :  { %1296 = vtanh.f32 %v333_v47 }
 0x2a5   :  { %1298 = vtanh.f32 %v335_v48 }
 0x2ae   :  { %v1297_v50 = vpop.eup %1296 }
 0x2af   :  { %v1299_v51 = vpop.eup %1298 }
 0x2b0   :  { %v337_v52 = vsel %vm179_vm2, %v1297_v50, %v1299_v51 }
 0x2b1   :  { %1072 = vmatmul.mubr.msk.f32.vlgmr.msra.gmra.mrb[2].mxu1 %vm181_vm3, %v337_v52 }
 0x2b2   :  { %1234 = vmatpush3.bf16.msra.mxu1 %v1381_v7  ;;  %1109 = vmatprep.mubr.msk.f32.mxu1 %vm1323_vm1, %v1324_v15 }
 0x2b3   :  { %1235 = vmatprep.subr.bf16.mxu1 %v1322_v8 }
 0x2b6   :  { %1237 = vmatpush3.bf16.msra.mxu1 %v1395_v11 }
 0x2b7   :  { %1238 = vmatprep.subr.bf16.mxu1 %v1322_v8 }
 0x2ba   :  { %1240 = vmatpush3.bf16.msra.mxu1 %v1404_v14 }
 0x2bb   :  { %1241 = vmatprep.subr.bf16.mxu1 %v1322_v8 }
 0x2be   :  { %1243 = vmatpush3.bf16.msra.mxu1 %v1418_v18 }
 0x2bf   :  { %1256 = vmatprep.subr.bf16.mxu1 %v1322_v8 }
 0x384   :  { %v407_v54 = vpop.f32.mrb[2].mxu1 }
 0x385   :  { %v411_v55 = vadd.f32 %v407_v54, %v155_v53  ;;  %v413_v56 = vadd.f32 %v1430_v19, %v407_v54  ;;  %v1073_v57 = vpop.f32.mrb[3].mxu1 }
 0x387   :  { %1300 = vtanh.f32 %v411_v55 }
 0x388   :  { %1302 = vtanh.f32 %v413_v56 }
 0x391   :  { %v1301_v58 = vpop.eup %1300 }
 0x392   :  { %v1303_v59 = vpop.eup %1302 }
 0x393   :  { %v415_v60 = vsel %vm179_vm2, %v1301_v58, %v1303_v59 }
 0x394   :  { %1091 = vmatmul.mubr.msk.f32.vlgmr.msra.gmra.mrb[10].mxu0 %vm181_vm3, %v415_v60 }
 0x395   :  { %1246 = vmatpush3.bf16.msra.mxu0 %v1381_v7  ;;  %1128 = vmatprep.mubr.msk.f32.mxu0 %vm1323_vm1, %v1324_v15 }
 0x396   :  { %1247 = vmatprep.subr.bf16.mxu0 %v1322_v8 }
 0x399   :  { %1249 = vmatpush3.bf16.msra.mxu0 %v1395_v11 }
 0x39a   :  { %1250 = vmatprep.subr.bf16.mxu0 %v1322_v8 }
 0x39d   :  { %1252 = vmatpush3.bf16.msra.mxu0 %v1404_v14 }
 0x39e   :  { %1253 = vmatprep.subr.bf16.mxu0 %v1322_v8 }
 0x3a1   :  { %1255 = vmatpush3.bf16.msra.mxu0 %v1418_v18 }
 0x3a2   :  { %1268 = vmatprep.subr.bf16.mxu0 %v1322_v8 }
 0x467   :  { %v485_v62 = vpop.f32.mrb[10].mxu0 }
 0x468   :  { %v489_v63 = vadd.f32 %v485_v62, %v160_v61  ;;  %v491_v0 = vadd.f32 %v1430_v19, %v485_v62  ;;  %v1092_v1 = vpop.f32.mrb[11].mxu0 }
 0x46a   :  { %1304 = vtanh.f32 %v489_v63 }
 0x46b   :  { %1306 = vtanh.f32 %v491_v0 }
 0x474   :  { %v1305_v2 = vpop.eup %1304 }
 0x475   :  { %v1307_v3 = vpop.eup %1306 }
 0x476   :  { %v493_v4 = vsel %vm179_vm2, %v1305_v2, %v1307_v3 }
 0x477   :  { %1110 = vmatmul.mubr.msk.f32.vlgmr.msra.gmra.mrb[4].mxu1 %vm181_vm3, %v493_v4 }
 0x478   :  { %1258 = vmatpush3.bf16.msra.mxu1 %v1381_v7  ;;  %1147 = vmatprep.mubr.msk.f32.mxu1 %vm1323_vm1, %v1324_v15 }
 0x479   :  { %1259 = vmatprep.subr.bf16.mxu1 %v1322_v8 }
 0x47c   :  { %1261 = vmatpush3.bf16.msra.mxu1 %v1395_v11 }
 0x47d   :  { %1262 = vmatprep.subr.bf16.mxu1 %v1322_v8 }
 0x480   :  { %1264 = vmatpush3.bf16.msra.mxu1 %v1404_v14 }
 0x481   :  { %1265 = vmatprep.subr.bf16.mxu1 %v1322_v8 }
 0x484   :  { %1267 = vmatpush3.bf16.msra.mxu1 %v1418_v18 }
 0x485   :  { %1280 = vmatprep.subr.bf16.mxu1 %v1322_v8 }
 0x54a   :  { %v563_v6 = vpop.f32.mrb[4].mxu1 }
 0x54b   :  { %v567_v9 = vadd.f32 %v563_v6, %v165_v5  ;;  %v569_v10 = vadd.f32 %v1430_v19, %v563_v6  ;;  %v1111_v12 = vpop.f32.mrb[5].mxu1 }
 0x54d   :  { %1308 = vtanh.f32 %v567_v9 }
 0x54e   :  { %1310 = vtanh.f32 %v569_v10 }
 0x557   :  { %v1309_v13 = vpop.eup %1308 }
 0x558   :  { %v1311_v16 = vpop.eup %1310 }
 0x559   :  { %v571_v17 = vsel %vm179_vm2, %v1309_v13, %v1311_v16 }
 0x55a   :  { %1129 = vmatmul.mubr.msk.f32.vlgmr.msra.gmra.mrb[12].mxu0 %vm181_vm3, %v571_v17 }
 0x55b   :  { %1270 = vmatpush3.bf16.msra.mxu0 %v1381_v7  ;;  %1166 = vmatprep.mubr.msk.f32.mxu0 %vm1323_vm1, %v1324_v15 }
 0x55c   :  { %1271 = vmatprep.subr.bf16.mxu0 %v1322_v8 }
 0x55f   :  { %1273 = vmatpush3.bf16.msra.mxu0 %v1395_v11 }
 0x560   :  { %1274 = vmatprep.subr.bf16.mxu0 %v1322_v8 }
 0x563   :  { %1276 = vmatpush3.bf16.msra.mxu0 %v1404_v14  ;;  %v175_v14 = vadd.f32 %v1487_v43, %v1430_v19 }
 0x564   :  { %1277 = vmatprep.subr.bf16.mxu0 %v1322_v8 }
 0x567   :  { %1279 = vmatpush3.bf16.msra.mxu0 %v1418_v18 }
 0x62d   :  { %v641_v21 = vpop.f32.mrb[12].mxu0 }
 0x62e   :  { %v645_v7 = vadd.f32 %v641_v21, %v170_v20  ;;  %v647_v22 = vadd.f32 %v1430_v19, %v641_v21  ;;  %v1130_v23 = vpop.f32.mrb[13].mxu0 }
 0x630   :  { %1312 = vtanh.f32 %v645_v7 }
 0x631   :  { %1314 = vtanh.f32 %v647_v22 }
 0x63a   :  { %v1313_v24 = vpop.eup %1312 }
 0x63b   :  { %v1315_v11 = vpop.eup %1314 }
 0x63c   :  { %v649_v25 = vsel %vm179_vm2, %v1313_v24, %v1315_v11 }
 0x63d   :  { %1148 = vmatmul.mubr.msk.f32.vlgmr.msra.gmra.mrb[6].mxu1 %vm181_vm3, %v649_v25 }
 0x63e   :  { %1177 = vmatprep.mubr.msk.f32.mxu1 %vm1323_vm1, %v1324_v15  ;;  %v803_v15 = vld [vmem:[%s1584_s4] sm:$0xff] }
 0x63f   :  { %v1281_v34 = vpack.c.bf16 %v804_v32, %v803_v15 }
 0x641   :  { %1282 = vmatpush3.bf16.msra.mxu1 %v1281_v34 }
 0x642   :  { %1283 = vmatprep.subr.bf16.mxu1 %v1322_v8 }
 0x645   :  { %1285 = vmatpush3.bf16.msra.mxu1 %v1284_v36 }
 0x710   :  { %v719_v18 = vpop.f32.mrb[6].mxu1 }
 0x711   :  { %v723_v26 = vadd.f32 %v719_v18, %v175_v14  ;;  %v725_v27 = vadd.f32 %v1430_v19, %v719_v18  ;;  %v1149_v28 = vpop.f32.mrb[7].mxu1 }
 0x713   :  { %1316 = vtanh.f32 %v723_v26 }
 0x714   :  { %1318 = vtanh.f32 %v725_v27 }
 0x71d   :  { %v1317_v29 = vpop.eup %1316 }
 0x71e   :  { %v1319_v30 = vpop.eup %1318 }
 0x71f   :  { %v727_v31 = vsel %vm179_vm2, %v1317_v29, %v1319_v30 }
 0x720   :  { %1167 = vmatmul.mubr.msk.f32.vlgmr.msra.gmra.mrb[14].mxu0 %vm181_vm3, %v727_v31 }
 0x7f3   :  { %v797_v37 = vpop.f32.mrb[14].mxu0 }
 0x7f4   :  { %v801_v38 = vadd.f32 %v1430_v19, %v797_v37  ;;  %v1168_v39 = vpop.f32.mrb[15].mxu0 }
 0x7f6   :  { %1320 = vtanh.f32 %v801_v38 }
 0x800   :  { %v1321_v40 = vpop.eup %1320 }
 0x801   :  { %815 = vrot.lane.b32.xlu0 %v1321_v40, %s1325_s14 }
 0x873   :  { %v816_v41 = vpop.permute.xlu0 %815 }
 0x874   :  { %1178 = vmatmul.mubr.msk.f32.vlgmr.msra.gmra.mrb[8].mxu1 %vm179_vm2, %v816_v41 }
 0x947   :  { %v885_v43 = vpop.f32.mrb[8].mxu1 }
 0x948   :  { %v886_v44 = vadd.f32 %v912_v42, %v885_v43  ;;  %v1179_v8 = vpop.f32.mrb[9].mxu1 }
 0x94a   :  { %890 = vst.msk [vmem:[%s1586_s6] sm:$0xff] %vm889_vm4, %v886_v44 }

</bundles_post_ra>
